<compile_context>
chip_gen: v5e
topology: v5e:2x2
jax: 0.10.0
libtpu: 0.0.40
codegen_flags: <defaults>
</compile_context>

<pallas_src>
import functools
import math

import jax
import jax.numpy as jnp
from jax.experimental import pallas as pl
from jax.experimental.pallas import tpu as pltpu


def _policy_forward_kernel(req_ref, crd_ref, w_ref, o_ref, *,
                           eval_specs, rnk_specs, crd_dim, out_size,
                           num_rnk, sub):
    """Fully fused PolicyNet forward.

    req_ref : (SUB, out_size)            -- batch rows 0..B-1, zero-padded to SUB
    crd_ref : (num_rnk*SUB, crd_dim)     -- rank i occupies rows [i*SUB, (i+1)*SUB)
    w_ref   : (TOTAL_ROWS, LANE)         -- all layer weights row-stacked, lane-padded
    o_ref   : (SUB, num_rnk!)
    eval_specs / rnk_specs: tuples of (row_offset, in_dim, out_dim) per layer.
    """
    f32 = jnp.float32
    req = req_ref[...]                                        # (SUB, out_size)
    crd = crd_ref[...]                                        # (R*SUB, crd_dim)

    # ---- evaluation MLP, layer 1 (split concat) ----------------------------
    off1, _din1, h1 = eval_specs[0]
    we1_crd = w_ref[off1:off1 + crd_dim, 0:h1]                # (crd_dim, h1)
    we1_req = w_ref[off1 + crd_dim:off1 + crd_dim + out_size, 0:h1]
    # Shared req contribution: computed once, tiled across rank groups once.
    req_c = jnp.dot(req, we1_req, preferred_element_type=f32)            # (SUB, h1)
    req_c = jnp.concatenate([req_c] * num_rnk, axis=0)                   # (R*SUB, h1)
    x = jnp.dot(crd, we1_crd, preferred_element_type=f32) + req_c
    x = jnp.maximum(x, 0.0)

    # ---- remaining eval layers (one batched matmul per layer) --------------
    for off, din, dout in eval_specs[1:]:
        w = w_ref[off:off + din, 0:dout]
        x = jnp.maximum(jnp.dot(x, w, preferred_element_type=f32), 0.0)
    eval_out = eval_specs[-1][2]                              # H

    # ---- ranking MLP, layer 1 (split over virtual concat [evl_*, req]) -----
    offr, _dinr, hr1 = rnk_specs[0]
    wr1_req = w_ref[offr + num_rnk * eval_out:
                    offr + num_rnk * eval_out + out_size, 0:hr1]
    acc = jnp.dot(req, wr1_req, preferred_element_type=f32)   # (SUB, hr1)
    for i in range(num_rnk):
        evl_i = x[i * sub:(i + 1) * sub, :]                   # 8-aligned sublane view
        wr1_i = w_ref[offr + i * eval_out:offr + (i + 1) * eval_out, 0:hr1]
        acc = acc + jnp.dot(evl_i, wr1_i, preferred_element_type=f32)

    y = acc
    n_rnk = len(rnk_specs)
    if n_rnk > 1:
        y = jnp.maximum(y, 0.0)                               # first rnk layer is hidden
        for li, (off, din, dout) in enumerate(rnk_specs[1:]):
            y = jnp.dot(y, w_ref[off:off + din, 0:dout],
                        preferred_element_type=f32)
            if li < n_rnk - 2:                                # ReLU on all but final layer
                y = jnp.maximum(y, 0.0)

    o_ref[...] = y.astype(o_ref.dtype)


def _round_up(x, m):
    return ((x + m - 1) // m) * m


class PolicyNetPallas:
    """JAX/Pallas port of PolicyNet (evaluation MLP + ranking MLP, bias-free)."""

    def __init__(self, emb_size=8, out_size=16, meta_size=4, coordi_size=4,
                 num_rnk=3, eval_node='[32,32,16][16]', key=None):
        self.num_rnk = num_rnk
        self.out_size = out_size
        self.crd_dim = emb_size * meta_size * coordi_size

        buf = eval_node[1:-1].split('][')
        num_hid_eval = list(map(int, buf[0].split(',')))
        num_hid_rnk = list(map(int, buf[1].split(',')))

        key = jax.random.PRNGKey(42) if key is None else key

        def make_w(k, fan_in, fan_out):
            # deterministic kaiming-uniform-style init, stored as (in, out)
            bound = 1.0 / math.sqrt(fan_in)
            return jax.random.uniform(k, (fan_in, fan_out), jnp.float32,
                                      minval=-bound, maxval=bound)

        # evaluation MLP: (crd_dim + out_size) -> hid ... , ReLU each
        self.eval_layers = []
        num_in = self.crd_dim + out_size
        for h in num_hid_eval:
            key, sub = jax.random.split(key)
            self.eval_layers.append(make_w(sub, num_in, h))
            num_in = h
        eval_out = num_in

        # ranking MLP: (eval_out*num_rnk + out_size) -> hid_rnk ... -> num_rnk!
        self.rnk_layers = []
        num_in = eval_out * num_rnk + out_size
        for h in num_hid_rnk + [math.factorial(num_rnk)]:
            key, sub = jax.random.split(key)
            self.rnk_layers.append(make_w(sub, num_in, h))
            num_in = h

        # ---- pack all weights once into a single row-stacked, lane-padded
        #      (TOTAL_ROWS, LANE) buffer; record per-layer (offset, in, out). --
        all_layers = self.eval_layers + self.rnk_layers
        max_out = max(w.shape[1] for w in all_layers)
        lane = _round_up(max_out, 128)
        specs = []
        row = 0
        for w in all_layers:
            specs.append((row, w.shape[0], w.shape[1]))
            row += _round_up(w.shape[0], 8)              # keep every offset 8-aligned
        total_rows = _round_up(row, 8)
        wpack = jnp.zeros((total_rows, lane), jnp.float32)
        for (off, din, dout), w in zip(specs, all_layers):
            wpack = wpack.at[off:off + din, :dout].set(w)
        self.wpack = wpack
        ne = len(self.eval_layers)
        self.eval_specs = tuple(specs[:ne])
        self.rnk_specs = tuple(specs[ne:])

    def __call__(self, req, crd):
        """req: (B, out_size) f32; crd: (B, num_rnk, crd_dim) f32."""
        B = req.shape[0]
        R = self.num_rnk
        SUB = _round_up(B, 8)                            # f32 sublane tile

        # Pad batch rows to a full sublane tile.
        req_pad = jnp.zeros((SUB, self.out_size), jnp.float32).at[:B, :].set(req)
        # Pack crd: rank i occupies rows [i*SUB, i*SUB+B), rest zero-padded.
        crd_t = jnp.transpose(crd, (1, 0, 2))            # (R, B, crd_dim)
        crd_pack = jnp.zeros((R, SUB, self.crd_dim), jnp.float32)
        crd_pack = crd_pack.at[:, :B, :].set(crd_t).reshape(R * SUB, self.crd_dim)

        out_dim = self.rnk_specs[-1][2]

        kernel = functools.partial(
            _policy_forward_kernel,
            eval_specs=self.eval_specs, rnk_specs=self.rnk_specs,
            crd_dim=self.crd_dim, out_size=self.out_size,
            num_rnk=R, sub=SUB)

        def full_spec(shape):
            nd = len(shape)
            return pl.BlockSpec(shape, lambda i, _nd=nd: (0,) * _nd)

        inputs = (req_pad, crd_pack, self.wpack)
        out = pl.pallas_call(
            kernel,
            out_shape=jax.ShapeDtypeStruct((SUB, out_dim), jnp.float32),
            grid=(1,),
            in_specs=[full_spec(a.shape) for a in inputs],
            out_specs=pl.BlockSpec((SUB, out_dim), lambda i: (0, 0)),
            compiler_params=pltpu.CompilerParams(
                dimension_semantics=("arbitrary",)),
        )(*inputs)
        return out[:B]

    # Pure-JAX reference (same math as the PyTorch module) for verification.
    def reference(self, req, crd):
        hp = jax.lax.Precision.HIGHEST
        evl_list = []
        for i in range(self.num_rnk):
            x = jnp.concatenate([crd[:, i, :], req], axis=1)
            for w in self.eval_layers:
                x = jnp.maximum(jnp.dot(x, w, precision=hp), 0.0)
            evl_list.append(x)
        x = jnp.concatenate(evl_list + [req], axis=1)
        n = len(self.rnk_layers)
        for li, w in enumerate(self.rnk_layers):
            x = jnp.dot(x, w, precision=hp)
            if li < n - 1:
                x = jnp.maximum(x, 0.0)
        return x


if __name__ == "__main__":
    B = 2
    emb_size, meta_size, coordi_size, out_size, num_rnk = 8, 4, 4, 16, 3
    crd_dim = emb_size * meta_size * coordi_size        # 128

    key = jax.random.PRNGKey(0)
    k_req, k_crd = jax.random.split(key)
    req = jax.random.normal(k_req, (B, out_size), jnp.float32)
    crd = jax.random.normal(k_crd, (B, num_rnk, crd_dim), jnp.float32)

    net = PolicyNetPallas(emb_size=emb_size, out_size=out_size,
                          meta_size=meta_size, coordi_size=coordi_size,
                          num_rnk=num_rnk, eval_node='[32,32,16][16]')

    out = net(req, crd)
    jax.block_until_ready(out)
    assert out.shape == (B, math.factorial(num_rnk)), out.shape

    ref = net.reference(req, crd)
    assert jnp.allclose(out, ref, rtol=1e-3, atol=1e-3), \
        float(jnp.max(jnp.abs(out - ref)))

    print("KERNEL_OK")
</pallas_src>

<mosaic_0001>
module attributes {stable_mosaic.version = 11 : i64} {
  func.func @_policy_forward_kernel(%arg0: i32, %arg1: memref<8x16xf32, #tpu.memory_space<vmem>>, %arg2: memref<24x128xf32, #tpu.memory_space<vmem>>, %arg3: memref<288x128xf32, #tpu.memory_space<vmem>>, %arg4: memref<8x6xf32, #tpu.memory_space<vmem>>) attributes {dimension_semantics = [#tpu.dimension_semantics<arbitrary>], iteration_bounds = array<i64: 1>, scalar_prefetch = 0 : i64, scratch_operands = 0 : i64, tpu.core_type = #tpu.core_type<tc>, window_params = [{pipeline_mode = #tpu.pipeline_mode<synchronous>, transform_indices = @transform_0, window_bounds = array<i64: 8, 16>}, {pipeline_mode = #tpu.pipeline_mode<synchronous>, transform_indices = @transform_1, window_bounds = array<i64: 24, 128>}, {pipeline_mode = #tpu.pipeline_mode<synchronous>, transform_indices = @transform_2, window_bounds = array<i64: 288, 128>}, {pipeline_mode = #tpu.pipeline_mode<synchronous>, transform_indices = @transform_3, window_bounds = array<i64: 8, 6>}]} {
    %c0 = arith.constant 0 : index
    %c0_0 = arith.constant 0 : index
    %0 = vector.load %arg1[%c0, %c0_0] : memref<8x16xf32, #tpu.memory_space<vmem>>, vector<8x16xf32>
    %c0_1 = arith.constant 0 : index
    %c0_2 = arith.constant 0 : index
    %1 = vector.load %arg2[%c0_1, %c0_2] : memref<24x128xf32, #tpu.memory_space<vmem>>, vector<24x128xf32>
    %c0_3 = arith.constant 0 : index
    %c0_4 = arith.constant 0 : index
    %2 = vector.load %arg3[%c0_3, %c0_4] : memref<288x128xf32, #tpu.memory_space<vmem>>, vector<128x32xf32>
    %c128 = arith.constant 128 : index
    %c0_5 = arith.constant 0 : index
    %3 = vector.load %arg3[%c128, %c0_5] : memref<288x128xf32, #tpu.memory_space<vmem>>, vector<16x32xf32>
    %cst = arith.constant dense<0.000000e+00> : vector<8x32xf32>
    %4 = tpu.matmul %0, %3, %cst {dimension_numbers = #tpu.dot_dimension_numbers<[1], [0], [0], [1], [0, 0, 1, 1], [], []>} : vector<8x16xf32>, vector<16x32xf32>, vector<8x32xf32> -> vector<8x32xf32>
    %5 = tpu.concatenate %4, %4, %4 in 0 : vector<8x32xf32>, vector<8x32xf32>, vector<8x32xf32> -> vector<24x32xf32>
    %cst_6 = arith.constant dense<0.000000e+00> : vector<24x32xf32>
    %6 = tpu.matmul %1, %2, %cst_6 {dimension_numbers = #tpu.dot_dimension_numbers<[1], [0], [0], [1], [0, 0, 1, 1], [], []>} : vector<24x128xf32>, vector<128x32xf32>, vector<24x32xf32> -> vector<24x32xf32>
    %7 = arith.addf %6, %5 : vector<24x32xf32>
    %cst_7 = arith.constant 0.000000e+00 : f32
    %8 = vector.broadcast %cst_7 : f32 to vector<24x32xf32>
    %9 = arith.maximumf %7, %8 : vector<24x32xf32>
    %c144 = arith.constant 144 : index
    %c0_8 = arith.constant 0 : index
    %10 = vector.load %arg3[%c144, %c0_8] : memref<288x128xf32, #tpu.memory_space<vmem>>, vector<32x32xf32>
    %cst_9 = arith.constant dense<0.000000e+00> : vector<24x32xf32>
    %11 = tpu.matmul %9, %10, %cst_9 {dimension_numbers = #tpu.dot_dimension_numbers<[1], [0], [0], [1], [0, 0, 1, 1], [], []>} : vector<24x32xf32>, vector<32x32xf32>, vector<24x32xf32> -> vector<24x32xf32>
    %cst_10 = arith.constant 0.000000e+00 : f32
    %12 = vector.broadcast %cst_10 : f32 to vector<24x32xf32>
    %13 = arith.maximumf %11, %12 : vector<24x32xf32>
    %c176 = arith.constant 176 : index
    %c0_11 = arith.constant 0 : index
    %14 = vector.load %arg3[%c176, %c0_11] : memref<288x128xf32, #tpu.memory_space<vmem>>, vector<32x16xf32>
    %cst_12 = arith.constant dense<0.000000e+00> : vector<24x16xf32>
    %15 = tpu.matmul %13, %14, %cst_12 {dimension_numbers = #tpu.dot_dimension_numbers<[1], [0], [0], [1], [0, 0, 1, 1], [], []>} : vector<24x32xf32>, vector<32x16xf32>, vector<24x16xf32> -> vector<24x16xf32>
    %cst_13 = arith.constant 0.000000e+00 : f32
    %16 = vector.broadcast %cst_13 : f32 to vector<24x16xf32>
    %17 = arith.maximumf %15, %16 : vector<24x16xf32>
    %c256 = arith.constant 256 : index
    %c0_14 = arith.constant 0 : index
    %18 = vector.load %arg3[%c256, %c0_14] : memref<288x128xf32, #tpu.memory_space<vmem>>, vector<16x16xf32>
    %cst_15 = arith.constant dense<0.000000e+00> : vector<8x16xf32>
    %19 = tpu.matmul %0, %18, %cst_15 {dimension_numbers = #tpu.dot_dimension_numbers<[1], [0], [0], [1], [0, 0, 1, 1], [], []>} : vector<8x16xf32>, vector<16x16xf32>, vector<8x16xf32> -> vector<8x16xf32>
    %20 = vector.extract_strided_slice %17 {offsets = [0, 0], sizes = [8, 16], strides = [1, 1]} : vector<24x16xf32> to vector<8x16xf32>
    %c208 = arith.constant 208 : index
    %c0_16 = arith.constant 0 : index
    %21 = vector.load %arg3[%c208, %c0_16] : memref<288x128xf32, #tpu.memory_space<vmem>>, vector<16x16xf32>
    %cst_17 = arith.constant dense<0.000000e+00> : vector<8x16xf32>
    %22 = tpu.matmul %20, %21, %cst_17 {dimension_numbers = #tpu.dot_dimension_numbers<[1], [0], [0], [1], [0, 0, 1, 1], [], []>} : vector<8x16xf32>, vector<16x16xf32>, vector<8x16xf32> -> vector<8x16xf32>
    %23 = arith.addf %19, %22 : vector<8x16xf32>
    %24 = vector.extract_strided_slice %17 {offsets = [8, 0], sizes = [8, 16], strides = [1, 1]} : vector<24x16xf32> to vector<8x16xf32>
    %c224 = arith.constant 224 : index
    %c0_18 = arith.constant 0 : index
    %25 = vector.load %arg3[%c224, %c0_18] : memref<288x128xf32, #tpu.memory_space<vmem>>, vector<16x16xf32>
    %cst_19 = arith.constant dense<0.000000e+00> : vector<8x16xf32>
    %26 = tpu.matmul %24, %25, %cst_19 {dimension_numbers = #tpu.dot_dimension_numbers<[1], [0], [0], [1], [0, 0, 1, 1], [], []>} : vector<8x16xf32>, vector<16x16xf32>, vector<8x16xf32> -> vector<8x16xf32>
    %27 = arith.addf %23, %26 : vector<8x16xf32>
    %28 = vector.extract_strided_slice %17 {offsets = [16, 0], sizes = [8, 16], strides = [1, 1]} : vector<24x16xf32> to vector<8x16xf32>
    %c240 = arith.constant 240 : index
    %c0_20 = arith.constant 0 : index
    %29 = vector.load %arg3[%c240, %c0_20] : memref<288x128xf32, #tpu.memory_space<vmem>>, vector<16x16xf32>
    %cst_21 = arith.constant dense<0.000000e+00> : vector<8x16xf32>
    %30 = tpu.matmul %28, %29, %cst_21 {dimension_numbers = #tpu.dot_dimension_numbers<[1], [0], [0], [1], [0, 0, 1, 1], [], []>} : vector<8x16xf32>, vector<16x16xf32>, vector<8x16xf32> -> vector<8x16xf32>
    %31 = arith.addf %27, %30 : vector<8x16xf32>
    %cst_22 = arith.constant 0.000000e+00 : f32
    %32 = vector.broadcast %cst_22 : f32 to vector<8x16xf32>
    %33 = arith.maximumf %31, %32 : vector<8x16xf32>
    %c272 = arith.constant 272 : index
    %c0_23 = arith.constant 0 : index
    %34 = vector.load %arg3[%c272, %c0_23] : memref<288x128xf32, #tpu.memory_space<vmem>>, vector<16x6xf32>
    %cst_24 = arith.constant dense<0.000000e+00> : vector<8x6xf32>
    %35 = tpu.matmul %33, %34, %cst_24 {dimension_numbers = #tpu.dot_dimension_numbers<[1], [0], [0], [1], [0, 0, 1, 1], [], []>} : vector<8x16xf32>, vector<16x6xf32>, vector<8x6xf32> -> vector<8x6xf32>
    %c0_25 = arith.constant 0 : index
    %c0_26 = arith.constant 0 : index
    %36 = vector.load %arg4[%c0_25, %c0_26] : memref<8x6xf32, #tpu.memory_space<vmem>>, vector<8x6xf32>
    tpu.vector_store %arg4[%c0_25, %c0_26], %35 {strides = array<i32>} : memref<8x6xf32, #tpu.memory_space<vmem>>, vector<8x6xf32>,
    return
  }
  func.func @transform_0(%arg0: i32) -> (i32, i32) {
    %c0_i32 = arith.constant 0 : i32
    %c0_i32_0 = arith.constant 0 : i32
    %c0_i32_1 = arith.constant 0 : i32
    return %c0_i32, %c0_i32_0 : i32, i32
  }
  func.func @transform_1(%arg0: i32) -> (i32, i32) {
    %c0_i32 = arith.constant 0 : i32
    %c0_i32_0 = arith.constant 0 : i32
    %c0_i32_1 = arith.constant 0 : i32
    return %c0_i32, %c0_i32_0 : i32, i32
  }
  func.func @transform_2(%arg0: i32) -> (i32, i32) {
    %c0_i32 = arith.constant 0 : i32
    %c0_i32_0 = arith.constant 0 : i32
    %c0_i32_1 = arith.constant 0 : i32
    return %c0_i32, %c0_i32_0 : i32, i32
  }
  func.func @transform_3(%arg0: i32) -> (i32, i32) {
    %c0_i32 = arith.constant 0 : i32
    %c0_i32_0 = arith.constant 0 : i32
    %c0_i32_1 = arith.constant 0 : i32
    return %c0_i32, %c0_i32_0 : i32, i32
  }
}

</mosaic_0001>

<bundles_post_ra>
// kernel: tpu_custom_call.1
= control target key start
LH: loop header
LB: loop body
LE: loop exit
PB: predicated region body
PF: predicated region fallthrough
CT: control target
= control target key end

     0   :  { %8 = vsyncpa [#allocation3], 0  ;;  %s539_s0 = inlined_call_operand.hbm [shape: f32[8,16], index: 0, kind: input, shape index: {}]   ;;  %s540_s1 = inlined_call_operand.hbm [shape: f32[24,128], index: 1, kind: input, shape index: {}]   ;;  %s541_s2 = inlined_call_operand.hbm [shape: f32[288,128], index: 2, kind: input, shape index: {}]   ;;  %s542_s3 = inlined_call_operand.hbm [shape: f32[8,6], index: 3, kind: output, shape index: {}]  }
   0x1   :  { %9 = vsyncpa [#allocation6], 0  ;;  %s26_s14 = sshll.u32 %s540_s1, 4  ;;  %s27_s14 = int_to_ptr.hbm [resolvable:$true] %s26_s14 }
   0x2   :  { %10 = vsyncpa [#allocation4], 0  ;;  %s485_s15 = smov [#allocation5]   ;;  %s16_s19 = sshll.u32 %s539_s0, 4  ;;  %s17_s19 = int_to_ptr.hbm [resolvable:$true] %s16_s19 }
   0x3   :  { %s28_s16 = sshll.u32 %s485_s15, 4  ;;  %s486_s20 = smov 128   ;;  %s29_s16 = int_to_ptr.vmem [resolvable:$true] %s28_s16 }
   0x4   :  { %s487_s21 = smov 8   ;;  %s488_s22 = smov [#allocation2]  }
   0x5   :  { %34 = dma.hbm_to_vmem [thread:$0]  %s27_s14, 384, %s29_s16, [#allocation6], %s486_s20, %s486_s20, %s487_s21  }
   0x6   :  { %s18_s23 = sshll.u32 %s488_s22, 4  ;;  %s39_s26 = sshll.u32 %s541_s2, 4  ;;  %s19_s23 = int_to_ptr.vmem [resolvable:$true] %s18_s23  ;;  %s40_s26 = int_to_ptr.hbm [resolvable:$true] %s39_s26 }
   0x7   :  { %21 = dma.hbm_to_vmem [thread:$0]  %s17_s19, 128, %s19_s23, [#allocation3]  }
   0x8   :  { %s489_s1 = smov [#allocation7]  }
   0x9   :  { %s41_s27 = sshll.u32 %s489_s1, 4  ;;  %s42_s27 = int_to_ptr.vmem [resolvable:$true] %s41_s27 }
   0xa   :  { %47 = dma.hbm_to_vmem [thread:$0]  %s40_s26, 4608, %s42_s27, [#allocation6], %s486_s20, %s486_s20, %s487_s21  }
   0xb   :  { %479 = dma.done.wait [#allocation3], 128  }
   0xc   :  { %480 = vsyncadd [#allocation3], 4294967168 }
   0xd   :  { %481 = dma.done.wait [#allocation6], 4992  }
   0xe   :  { %482 = vsyncadd [#allocation6], 4294962304  ;;  %v79_v0 = vld [vmem:[#allocation7 + $0x78] sm:$0xff]  ;;  %v78_v1 = vld [vmem:[#allocation7 + $0x70] sm:$0xff]  ;;  %vm82_vm0 = vcmask 130048   ;;  %vm139_vm1 = vcmask 261120  }
   0xf   :  { %106 = vmatpush.msra.mxu1 %v79_v0  ;;  %v77_v2 = vld [vmem:[#allocation7 + $0x68] sm:$0xff]  ;;  %v76_v3 = vld [vmem:[#allocation7 + $0x60] sm:$0xff]  ;;  %v75_v6 = vld [vmem:[#allocation7 + $0x58] sm:$0xff]  ;;  %s490_s0 = smov [#allocation8]   ;;  %s354_s30 = sshll.u32 %s542_s3, 4  ;;  %vm345_vm2 = vcmask 48128   ;;  %s355_s30 = int_to_ptr.hbm [resolvable:$true] %s354_s30 }
  0x10   :  { %v81_v4 = vld [vmem:[#allocation7 + $0x88] sm:$0xff]  ;;  %v80_v5 = vld [vmem:[#allocation7 + $0x80] sm:$0xff]  ;;  %v74_v8 = vld [vmem:[#allocation7 + $0x50] sm:$0xff]  ;;  %s352_s2 = sshll.u32 %s490_s0, 4  ;;  %s353_s2 = int_to_ptr.vmem [resolvable:$true] %s352_s2 }
  0x11   :  { %107 = vmatpush.msra.mxu1 %v78_v1  ;;  %100 = vmatpush.msra.mxu0 %v81_v4  ;;  %v520_v7 = vld [vmem:[#allocation2] sm:$0xff]  ;;  %v73_v9 = vld [vmem:[#allocation7 + $0x48] sm:$0xff]  ;;  %v71_v11 = vld [vmem:[#allocation7 + $0x38] sm:$0xff] }
  0x12   :  { %v72_v10 = vld [vmem:[#allocation7 + $0x40] sm:$0xff]  ;;  %v70_v12 = vld [vmem:[#allocation7 + $0x30] sm:$0xff]  ;;  %v138_v13 = vld [vmem:[#allocation7 + $0xa8] sm:$0xff] }
  0x13   :  { %108 = vmatpush.msra.mxu1 %v77_v2  ;;  %101 = vmatpush.msra.mxu0 %v80_v5  ;;  %v69_v14 = vld [vmem:[#allocation7 + $0x28] sm:$0xff]  ;;  %v68_v15 = vld [vmem:[#allocation7 + $0x20] sm:$0xff]  ;;  %v67_v16 = vld [vmem:[#allocation7 + $0x18] sm:$0xff] }
  0x14   :  { %365 = vmatmul.msk.f32.vlgmr.msra.gmra.mxu0 %vm82_vm0, %v520_v7  ;;  %161 = vmatpush.msra.mxu2 %v138_v13  ;;  %v66_v17 = vld [vmem:[#allocation7 + $0x10] sm:$0xff]  ;;  %v65_v18 = vld [vmem:[#allocation7 + $0x8] sm:$0xff]  ;;  %v64_v19 = vld [vmem:[#allocation7] sm:$0xff] }
  0x15   :  { %109 = vmatpush.msra.mxu1 %v76_v3  ;;  %v61_v20 = vld [vmem:[#allocation5] sm:$0xff]  ;;  %v62_v21 = vld [vmem:[#allocation5 + $0x8] sm:$0xff]  ;;  %v63_v22 = vld [vmem:[#allocation5 + $0x10] sm:$0xff] }
  0x16   :  { %v137_v23 = vld [vmem:[#allocation7 + $0xa0] sm:$0xff]  ;;  %v136_v24 = vld [vmem:[#allocation7 + $0x98] sm:$0xff]  ;;  %v135_v25 = vld [vmem:[#allocation7 + $0x90] sm:$0xff] }
  0x17   :  { %110 = vmatpush.msra.mxu1 %v75_v6  ;;  %162 = vmatpush.msra.mxu2 %v137_v23  ;;  %v181_v26 = vld [vmem:[#allocation7 + $0xc8] sm:$0xff]  ;;  %v180_v27 = vld [vmem:[#allocation7 + $0xc0] sm:$0xff]  ;;  %v179_v38 = vld [vmem:[#allocation7 + $0xb8] sm:$0xff] }
  0x18   :  { %203 = vmatpush.msra.mxu3 %v181_v26  ;;  %v178_v39 = vld [vmem:[#allocation7 + $0xb0] sm:$0xff]  ;;  %v294_v40 = vld [vmem:[#allocation7 + $0xf8] sm:$0xff]  ;;  %v221_v49 = vld [vmem:[#allocation7 + $0x108] sm:$0xff] }
  0x19   :  { %111 = vmatpush.msra.mxu1 %v74_v8  ;;  %163 = vmatpush.msra.mxu2 %v136_v24  ;;  %v223_v41 = vld [vmem:[#allocation7 + $0xd8] sm:$0xff]  ;;  %v222_v48 = vld [vmem:[#allocation7 + $0xd0] sm:$0xff]  ;;  %v220_v51 = vld [vmem:[#allocation7 + $0x100] sm:$0xff] }
  0x1a   :  { %204 = vmatpush.msra.mxu3 %v180_v27  ;;  %241 = vmatpush.msrb.mxu0 %v223_v41  ;;  %v293_v50 = vld [vmem:[#allocation7 + $0xf0] sm:$0xff]  ;;  %v268_v54 = vld [vmem:[#allocation7 + $0xe8] sm:$0xff]  ;;  %v267_v55 = vld [vmem:[#allocation7 + $0xe0] sm:$0xff] }
  0x1b   :  { %112 = vmatpush.msra.mxu1 %v73_v9  ;;  %164 = vmatpush.msra.mxu2 %v135_v25  ;;  %v321_v60 = vld [vmem:[#allocation7 + $0x118] sm:$0xff]  ;;  %v320_v61 = vld [vmem:[#allocation7 + $0x110] sm:$0xff] }
  0x1c   :  { %205 = vmatpush.msra.mxu3 %v179_v38  ;;  %242 = vmatpush.msrb.mxu0 %v222_v48 }
  0x1d   :  { %113 = vmatpush.msra.mxu1 %v72_v10  ;;  %312 = vmatpush.msrb.mxu2 %v294_v40 }
  0x1e   :  { %206 = vmatpush.msra.mxu3 %v178_v39  ;;  %261 = vmatpush.msra.mxu0 %v221_v49 }
  0x1f   :  { %114 = vmatpush.msra.mxu1 %v71_v11  ;;  %313 = vmatpush.msrb.mxu2 %v293_v50 }
  0x20   :  { %262 = vmatpush.msra.mxu0 %v220_v51  ;;  %339 = vmatpush.msrb.mxu3 %v321_v60 }
  0x21   :  { %115 = vmatpush.msra.mxu1 %v70_v12 }
  0x22   :  { %340 = vmatpush.msrb.mxu3 %v320_v61 }
  0x23   :  { %116 = vmatpush.msra.mxu1 %v69_v14 }
  0x25   :  { %117 = vmatpush.msra.mxu1 %v68_v15 }
  0x27   :  { %118 = vmatpush.msra.mxu1 %v67_v16 }
  0x29   :  { %119 = vmatpush.msra.mxu1 %v66_v17 }
  0x2b   :  { %120 = vmatpush.msra.mxu1 %v65_v18 }
  0x2d   :  { %121 = vmatpush.msra.mxu1 %v64_v19 }
  0x2e   :  { %122 = vmatmul.f32.vlgmr.msra.gmra.mxu1 %v61_v20 }
  0x36   :  { %125 = vmatmul.f32.gmra.mxu1 %v62_v21 }
  0x3e   :  { %128 = vmatmul.f32.gmra.mxu1 %v63_v22 }
  0x91   :  { %v103_v28 = vpop.f32.mrf.mxu0 }
  0xab   :  { %v123_v29 = vpop.f32.mrf.mxu1 }
  0xac   :  { %v124_v30 = vadd.f32 %v123_v29, %v103_v28 }
  0xae   :  { %v132_v31 = vmax.f32 %v124_v30, 0.0 }
  0xb0   :  { %366 = vmatmul.msk.f32.vlgmr.msra.gmra.mxu2 %vm139_vm1, %v132_v31 }
  0xb3   :  { %v126_v32 = vpop.f32.mrf.mxu1 }
  0xb4   :  { %v127_v33 = vadd.f32 %v126_v32, %v103_v28 }
  0xb6   :  { %v133_v34 = vmax.f32 %v127_v33, 0.0 }
  0xb8   :  { %367 = vmatmul.msk.f32.gmra.mxu2 %vm139_vm1, %v133_v34 }
  0xbb   :  { %v129_v35 = vpop.f32.mrf.mxu1 }
  0xbc   :  { %v130_v36 = vadd.f32 %v129_v35, %v103_v28 }
  0xbe   :  { %v134_v37 = vmax.f32 %v130_v36, 0.0 }
  0xc0   :  { %368 = vmatmul.msk.f32.gmra.mxu2 %vm139_vm1, %v134_v37 }
 0x133   :  { %v166_v42 = vpop.f32.mrf.mxu2 }
 0x134   :  { %v175_v43 = vmax.f32 %v166_v42, 0.0 }
 0x136   :  { %369 = vmatmul.msk.f32.vlgmr.msra.gmra.mxu3 %vm139_vm1, %v175_v43 }
 0x13b   :  { %v169_v44 = vpop.f32.mrf.mxu2 }
 0x13c   :  { %v176_v45 = vmax.f32 %v169_v44, 0.0 }
 0x13e   :  { %370 = vmatmul.msk.f32.gmra.mxu3 %vm139_vm1, %v176_v45 }
 0x143   :  { %v172_v46 = vpop.f32.mrf.mxu2 }
 0x144   :  { %v177_v47 = vmax.f32 %v172_v46, 0.0 }
 0x146   :  { %371 = vmatmul.msk.f32.gmra.mxu3 %vm139_vm1, %v177_v47 }
 0x1b9   :  { %v208_v52 = vpop.f32.mrf.mxu3 }
 0x1ba   :  { %v217_v53 = vmax.f32 %v208_v52, 0.0 }
 0x1bc   :  { %372 = vmatmul.msk.f32.vlgmr.msrb.gmra.mxu0 %vm82_vm0, %v217_v53 }
 0x1bd   :  { %286 = vmatpush.msrb.mxu0 %v268_v54 }
 0x1bf   :  { %287 = vmatpush.msrb.mxu0 %v267_v55 }
 0x1c1   :  { %v211_v56 = vpop.f32.mrf.mxu3 }
 0x1c2   :  { %v218_v58 = vmax.f32 %v211_v56, 0.0 }
 0x1c4   :  { %373 = vmatmul.msk.f32.vlgmr.msra.gmra.mxu0 %vm82_vm0, %v520_v7 }
 0x1c9   :  { %v214_v57 = vpop.f32.mrf.mxu3 }
 0x1ca   :  { %v219_v59 = vmax.f32 %v214_v57, 0.0 }
 0x1cc   :  { %374 = vmatmul.msk.f32.vlgmr.msrb.gmra.mxu0 %vm82_vm0, %v218_v58  ;;  %375 = vmatmul.msk.f32.vlgmr.msrb.gmra.mxu2 %vm82_vm0, %v219_v59 }
 0x239   :  { %v244_v62 = vpop.f32.mrf.mxu0 }
 0x241   :  { %v264_v63 = vpop.f32.mrf.mxu0 }
 0x242   :  { %v265_v1 = vadd.f32 %v264_v63, %v244_v62 }
 0x249   :  { %v289_v0 = vpop.f32.mrf.mxu0 }
 0x24a   :  { %v292_v2 = vadd.f32 %v289_v0, %v265_v1 }
 0x24f   :  { %v315_v3 = vpop.f32.mrf.mxu2 }
 0x250   :  { %v318_v4 = vadd.f32 %v315_v3, %v292_v2 }
 0x252   :  { %v319_v5 = vmax.f32 %v318_v4, 0.0 }
 0x254   :  { %376 = vmatmul.msk.f32.vlgmr.msrb.gmra.mxu3 %vm82_vm0, %v319_v5 }
 0x2d7   :  { %v342_v6 = vpop.f32.mrf.mxu3 }
 0x2d8   :  { %346 = vst.msk [vmem:[#allocation8] sm:$0xff] %vm345_vm2, %v342_v6 }
 0x2d9   :  { %357 = dma.vmem_to_hbm [thread:$0]  %s353_s2, 128, %s355_s30, [#allocation4]  }
 0x2da   :  { %483 = dma.done.wait [#allocation4], 128  }
 0x2db   :  { %484 = vsyncadd [#allocation4], 4294967168 }
 0x2dc   :  { %362 = vsyncpa [#allocation3], 1 }
 0x2dd   :  { %363 = vsyncpa [#allocation6], 1 }
 0x2de   :  { %364 = vsyncpa [#allocation4], 1 }

</bundles_post_ra>
